<compile_context>
chip_gen: v7x
topology: tpu7x:2x2x1
jax: 0.10.0
libtpu: 0.0.40
codegen_flags: <defaults>
</compile_context>

<pallas_src>
import functools

import jax
import jax.numpy as jnp
from jax.experimental import pallas as pl
from jax.experimental.pallas import tpu as pltpu

_LANE = 128
_TARGET_TILE_BYTES = 4 * 1024 * 1024   # 4 MiB per input tile (x2 double-buffered)


def _tensorcores_per_chip() -> int:
    """2-way split only where a second TensorCore exists (v7x-class chips)."""
    # TODO(synk): confirm megacore sharding of the leading "parallel" axis on
    #             v7x (CORE_PARALLEL / core_map alternative not exercised here).
    try:
        kind = (getattr(jax.devices()[0], "device_kind", "") or "").lower()
        if "v7" in kind:
            return 2
    except Exception:
        pass
    return 1


def _partial_sum_kernel(x_ref, o_ref, *, inner_blocks, num_blocks, clamp):
    s = pl.program_id(0)   # TensorCore split ("parallel")
    j = pl.program_id(1)   # streaming reduction step ("arbitrary")

    @pl.when(j == 0)
    def _init():
        o_ref[...] = jnp.zeros_like(o_ref)

    def _accumulate():
        # Upcast in-kernel (native dtype streamed from HBM), then fold the
        # (block_rows, 128) tile into the resident (8, 128) output block with
        # pure VALU adds.  The reshape keeps the native (8, 128) tiling.
        x = x_ref[...].astype(jnp.float32)
        o_ref[...] += jnp.sum(x.reshape(-1, 8, _LANE), axis=0)

    if clamp:
        # Uneven core split: the clamped duplicate tile contributes nothing.
        pl.when(s * inner_blocks + j < num_blocks)(_accumulate)
    else:
        _accumulate()


def loss_forward(x_fake: jax.Array, reg: float = 1.0, *, use_kernel=None,
                 tile_bytes=None, force_nsplit=None) -> jax.Array:
    """reg * mean(compute(x_fake)) with compute = identity (module defaults)."""
    reg = float(reg)
    n = x_fake.size

    # Stream f32 / bf16 natively; everything else is cast to f32 up front.
    if x_fake.dtype in (jnp.dtype(jnp.float32), jnp.dtype(jnp.bfloat16)):
        x = x_fake
    else:
        x = x_fake.astype(jnp.float32)
    itemsize = jnp.dtype(x.dtype).itemsize
    sub_mult = 32 // itemsize            # sublane packing: 8 for f32, 16 for bf16

    flat = x.reshape(-1)                 # metadata-only reshape
    rows_total = n // _LANE

    if tile_bytes is None:
        tile_bytes = _TARGET_TILE_BYTES
    target_rows = max(sub_mult, tile_bytes // (_LANE * itemsize))
    target_rows = (target_rows // sub_mult) * sub_mult

    block_rows = min(target_rows, (rows_total // sub_mult) * sub_mult)

    if use_kernel is None:
        # Tiny inputs: launch + pipeline prologue dominates; XLA's fused reduce wins.
        use_kernel = rows_total * _LANE * itemsize >= (1 << 20)
    if (not use_kernel) or block_rows < sub_mult:
        return (jnp.float32(reg) * jnp.mean(flat.astype(jnp.float32))).astype(jnp.float32)

    # The kernel handles an exact multiple of block_rows -> no ragged tile, no
    # in-kernel mask, no OOB reads.  The (< one tile) remainder is a tiny
    # plain-JAX tail sum.
    num_blocks = rows_total // block_rows
    rows_kernel = num_blocks * block_rows
    main = rows_kernel * _LANE

    if main < n:
        tail_sum = jnp.sum(flat[main:], dtype=jnp.float32)
        slab = flat[:main]
    else:
        tail_sum = jnp.float32(0.0)
        slab = flat
    x2d = slab.reshape(rows_kernel, _LANE)   # free when main == n (no pad copy)

    nsplit = force_nsplit if force_nsplit is not None else _tensorcores_per_chip()
    nsplit = max(1, min(int(nsplit), num_blocks))
    inner_blocks = (num_blocks + nsplit - 1) // nsplit
    clamp = nsplit * inner_blocks > num_blocks

    if clamp:
        def in_index(s, j):
            return (jnp.minimum(s * inner_blocks + j, num_blocks - 1), 0)
    else:
        def in_index(s, j):
            return (s * inner_blocks + j, 0)

    kernel = functools.partial(
        _partial_sum_kernel,
        inner_blocks=inner_blocks,
        num_blocks=num_blocks,
        clamp=clamp,
    )

    partials = pl.pallas_call(
        kernel,
        out_shape=jax.ShapeDtypeStruct((nsplit * 8, _LANE), jnp.float32),
        grid_spec=pltpu.PrefetchScalarGridSpec(
            num_scalar_prefetch=0,
            grid=(nsplit, inner_blocks),
            in_specs=[pl.BlockSpec((block_rows, _LANE), in_index)],
            out_specs=pl.BlockSpec((8, _LANE), lambda s, j: (s, 0)),
        ),
        compiler_params=pltpu.CompilerParams(
            dimension_semantics=("parallel", "arbitrary"),
        ),
    )(x2d)

    # Final cross-lane reduce + reg / numel scaling in the wrapper (tiny).
    total = jnp.sum(partials, dtype=jnp.float32) + tail_sum
    return (total * jnp.float32(reg / n)).astype(jnp.float32)


if __name__ == "__main__":
    key = jax.random.PRNGKey(0)
    # Small shapes consistent with the module's usage (x_fake is a generic tensor).
    B, C, H, W = 2, 4, 16, 16
    x_fake = jax.random.normal(key, (B, C, H, W), dtype=jnp.float32)

    reg = 1.0
    threshold = 10.0

    # Force the kernel path for the demo (the auto-heuristic would bypass it
    # for an input this small).
    loss = loss_forward(x_fake, reg=reg, use_kernel=True)
    jax.block_until_ready(loss)

    ref = reg * jnp.mean(x_fake)
    assert jnp.allclose(loss, ref, rtol=1e-5, atol=1e-6), (loss, ref)

    # Secondary check: exercises multi-block streaming, the 2-way core split,
    # index clamping (odd block count), duplicate-tile skipping and the
    # plain-JAX tail path.  Small tile_bytes keeps the test input small.
    x_big = jax.random.normal(jax.random.PRNGKey(1), (2, 4, 103, 103), jnp.float32)
    loss_big = loss_forward(x_big, reg=0.5, use_kernel=True,
                            tile_bytes=64 * 1024, force_nsplit=2)
    jax.block_until_ready(loss_big)
    ref_big = 0.5 * jnp.mean(x_big)
    assert jnp.allclose(loss_big, ref_big, rtol=1e-5, atol=1e-6), (loss_big, ref_big)

    # Third check: native bf16 streaming with in-kernel upcast.
    x_bf16 = jax.random.normal(jax.random.PRNGKey(2), (2, 4, 64, 64), jnp.bfloat16)
    loss_bf = loss_forward(x_bf16, reg=2.0, use_kernel=True, tile_bytes=64 * 1024)
    jax.block_until_ready(loss_bf)
    ref_bf = 2.0 * jnp.mean(x_bf16.astype(jnp.float32))
    assert jnp.allclose(loss_bf, ref_bf, rtol=1e-5, atol=1e-6), (loss_bf, ref_bf)

    # `success` property equivalent (componentwise loss = identity transform).
    success = bool(jnp.all(x_fake <= threshold))
    _ = success  # not printed; forward pass is the required output

    print("KERNEL_OK")
</pallas_src>

<mosaic_0001>
module attributes {stable_mosaic.version = 11 : i64} {
  func.func @_partial_sum_kernel(%arg0: i32, %arg1: i32, %arg2: memref<16x128xf32, #tpu.memory_space<vmem>>, %arg3: memref<8x128xf32, #tpu.memory_space<vmem>>) attributes {dimension_semantics = [#tpu.dimension_semantics<parallel>, #tpu.dimension_semantics<arbitrary>], iteration_bounds = array<i64: 1, 1>, scalar_prefetch = 0 : i64, scratch_operands = 0 : i64, tpu.core_type = #tpu.core_type<tc>, window_params = [{transform_indices = @transform_0, window_bounds = array<i64: 16, 128>}, {transform_indices = @transform_1, window_bounds = array<i64: 8, 128>}]} {
    %c0_i32 = arith.constant 0 : i32
    %0 = arith.cmpi eq, %arg1, %c0_i32 : i32
    %1 = arith.extui %0 : i1 to i32
    %c0_i32_0 = arith.constant 0 : i32
    %2 = arith.cmpi ne, %1, %c0_i32_0 : i32
    scf.if %2 {
      %cst_6 = arith.constant 0.000000e+00 : f32
      %9 = vector.broadcast %cst_6 : f32 to vector<8x128xf32>
      %c0_7 = arith.constant 0 : index
      %c0_8 = arith.constant 0 : index
      %10 = vector.load %arg3[%c0_7, %c0_8] : memref<8x128xf32, #tpu.memory_space<vmem>>, vector<8x128xf32>
      tpu.vector_store %arg3[%c0_7, %c0_8], %9 {strides = array<i32>} : memref<8x128xf32, #tpu.memory_space<vmem>>, vector<8x128xf32>,
    } else {
    }
    %c0 = arith.constant 0 : index
    %c0_1 = arith.constant 0 : index
    %3 = vector.load %arg2[%c0, %c0_1] : memref<16x128xf32, #tpu.memory_space<vmem>>, vector<16x128xf32>
    %c0_2 = arith.constant 0 : index
    %c0_3 = arith.constant 0 : index
    %4 = vector.load %arg3[%c0_2, %c0_3] : memref<8x128xf32, #tpu.memory_space<vmem>>, vector<8x128xf32>
    %5 = vector.shape_cast %3 : vector<16x128xf32> to vector<2x8x128xf32>
    %cst = arith.constant dense<0.000000e+00> : vector<8x128xf32>
    %6 = vector.multi_reduction <add>, %5, %cst [0] : vector<2x8x128xf32> to vector<8x128xf32>
    %7 = arith.addf %4, %6 : vector<8x128xf32>
    %c0_4 = arith.constant 0 : index
    %c0_5 = arith.constant 0 : index
    %8 = vector.load %arg3[%c0_4, %c0_5] : memref<8x128xf32, #tpu.memory_space<vmem>>, vector<8x128xf32>
    tpu.vector_store %arg3[%c0_4, %c0_5], %7 {strides = array<i32>} : memref<8x128xf32, #tpu.memory_space<vmem>>, vector<8x128xf32>,
    return
  }
  func.func @transform_0(%arg0: i32, %arg1: i32) -> (i32, i32) {
    %c1_i32 = arith.constant 1 : i32
    %0 = arith.muli %arg0, %c1_i32 : i32
    %1 = arith.addi %0, %arg1 : i32
    %c0_i32 = arith.constant 0 : i32
    %c0_i32_0 = arith.constant 0 : i32
    return %1, %c0_i32 : i32, i32
  }
  func.func @transform_1(%arg0: i32, %arg1: i32) -> (i32, i32) {
    %c0_i32 = arith.constant 0 : i32
    %c0_i32_0 = arith.constant 0 : i32
    return %arg0, %c0_i32 : i32, i32
  }
}

</mosaic_0001>

<bundles_post_ra>
// kernel: tpu_custom_call.1
= control target key start
LH: loop header
LB: loop body
LE: loop exit
PB: predicated region body
PF: predicated region fallthrough
CT: control target
= control target key end

     0   :  { %6 = vsyncpa [#allocation3], 0  ;;  %s146_s0 = inlined_call_operand.hbm [shape: f32[16,128], index: 0, kind: input, shape index: {}]   ;;  %s147_s1 = inlined_call_operand.hbm [shape: f32[8,128], index: 1, kind: output, shape index: {}]  }
   0x1   :  { %7 = vsyncpa [#allocation4], 0  ;;  %s108_s6 = smov [#allocation2]   ;;  %s60_s10 = scalar_lea.hbm %s146_s0, 256 }
   0x2   :  { %s17_s7 = sshll.u32 %s108_s6, 4  ;;  %p61_p0 = scmp.ne.s32.totalorder %s146_s0, %s60_s10  ;;  %s18_s7 = int_to_ptr.vmem [resolvable:$true] %s17_s7 }
   0x3   :  { %p64_p1 = scmp.lt.u32.totalorder %s60_s10, %s146_s0 }
   0x5   :  { %p66_p2 = pnand %p64_p1, %p61_p0 }
   0x7   :  { %69 = shalt.err (!%p66_p2)
}
   0x8   :  { %s70_s15 = scalar_lea.vmem %s18_s7, 256  ;;  %p75_p4 = scmp.lt.s32.totalorder %s18_s7, %s18_s7 }
   0x9   :  { %p71_p3 = scmp.ne.s32.totalorder %s18_s7, %s70_s15  ;;  %p76_p5 = scmp.lt.s32.totalorder %s70_s15, %s70_s15 }
   0xb   :  { %p77_p6 = por %p76_p5, %p75_p4 }
   0xd   :  { %p78_p7 = pnand %p77_p6, %p71_p3 }
   0xf   :  { %81 = shalt.err (!%p78_p7)
}
  0x10   :  { %s109_s16 = smov 128   ;;  %s110_s17 = smov 8  }
  0x11   :  { %23 = dma.hbm_to_vmem [thread:$0]  %s146_s0, 256, %s18_s7, [#allocation3], %s109_s16, %s109_s16, %s110_s17  }
  0x12   :  { %104 = dma.done.wait [#allocation3], 256  }
  0x13   :  { %105 = vsyncadd [#allocation3], 4294967040  ;;  %v34_v0 = vld [vmem:[#allocation2] sm:$0xff]  ;;  %v35_v1 = vld [vmem:[#allocation2 + $0x8] sm:$0xff]  ;;  %s111_s20 = smov [#allocation5]  }
  0x14   :  { %s46_s21 = sshll.u32 %s111_s20, 4  ;;  %v37_v2 = vadd.f32 %v35_v1, %v34_v0  ;;  %s47_s21 = int_to_ptr.vmem [resolvable:$true] %s46_s21 }
  0x15   :  { %s82_s22 = scalar_lea.vmem %s47_s21, 128  ;;  %p87_p9 = scmp.lt.s32.totalorder %s47_s21, %s47_s21 }
  0x16   :  { %39 = vst [vmem:[#allocation5] sm:$0xff] %v37_v2  ;;  %p83_p8 = scmp.ne.s32.totalorder %s47_s21, %s82_s22  ;;  %p88_p10 = scmp.lt.s32.totalorder %s82_s22, %s82_s22 }
  0x18   :  { %p89_p11 = por %p88_p10, %p87_p9 }
  0x1a   :  { %p90_p12 = pnand %p89_p11, %p83_p8 }
  0x1c   :  { %93 = shalt.err (!%p90_p12)
}
  0x1d   :  { %s94_s0 = scalar_lea.hbm %s147_s1, 128 }
  0x1e   :  { %p95_p13 = scmp.ne.s32.totalorder %s147_s1, %s94_s0  ;;  %p98_p0 = scmp.lt.u32.totalorder %s94_s0, %s147_s1 }
  0x20   :  { %p100_p1 = pnand %p98_p0, %p95_p13 }
  0x22   :  { %103 = shalt.err (!%p100_p1)
}
  0x23   :  { %49 = dma.vmem_to_hbm [thread:$0]  %s47_s21, 128, %s147_s1, [#allocation4]  }
  0x24   :  { %106 = dma.done.wait [#allocation4], 128  }
  0x25   :  { %107 = vsyncadd [#allocation4], 4294967168 }
  0x26   :  { %53 = vsyncpa [#allocation3], 1 }
  0x27   :  { %54 = vsyncpa [#allocation4], 1 }

</bundles_post_ra>
